<compile_context>
chip_gen: v7x
topology: tpu7x:2x2x1
jax: 0.10.0
libtpu: 0.0.40
codegen_flags: <defaults>
</compile_context>

<pallas_src>
import jax
import jax.numpy as jnp
from jax import lax
from jax.experimental import pallas as pl
from jax.experimental.pallas import tpu as pltpu

# ---------------- small, module-consistent dims ----------------
B = 2              # batch
BP = 8             # batch padded to a full sublane tile (perf item 1)
S = 8              # seq len
WORD_VOCAB = 50
BIWORD_VOCAB = 60
WORD_EMB = 32      # word_emb_dim
BIWORD_EMB = 16    # biword_emb_dim
D_IN = WORD_EMB + BIWORD_EMB     # char_feature_dim (use_bert=False)
H = 32             # lstm_hidden (HP_hidden_dim); bilstm => feature dim 2H
LABELS = 10        # label_alphabet_size
T = LABELS + 2     # hidden2tag output size (label_alphabet_size + 2)
TPAD = 128         # lane-dense padded tag dim for the kernel output
START_TAG = T - 2
STOP_TAG = T - 1


# =======================  Pallas kernel: fused BiLSTM + hidden2tag  =======================
# Fused gate-column layout (each block H wide): [ i_f | i_b | f_f | f_b | o_f | o_b | g_f | g_b ]
#   -> sigmoid gates occupy the contiguous first 6H columns, tanh (g) gate the last 2H.
# Row r = t*BP + b carries: fwd direction at time t (cols *_f), bwd direction at time S-1-t (cols *_b).
def _bilstm_tag_kernel(x2_ref,     # (S*BP, 2*D_IN) bf16  rows: [x_t | x_{S-1-t}]
                       wih_ref,    # (2*D_IN, 8H)   bf16  blockdiag(W_ih_f, W_ih_b), fused cols
                       bih_ref,    # (1, 8H)        f32   fused (b_ih+b_hh) for both dirs
                       whh_ref,    # (2H, 8H)       bf16  blockdiag(W_hh_f, W_hh_b), fused cols
                       wtagf_ref,  # (H, TPAD)      bf16  hidden2tag rows for fwd half (zero-padded)
                       wtagb_ref,  # (H, TPAD)      bf16  hidden2tag rows for bwd half (zero-padded)
                       btag_ref,   # (1, TPAD)      f32   hidden2tag bias (zero-padded)
                       out_ref):   # (S*BP, TPAD)   f32   emission scores, lane-dense
    # ---- hoisted input projection for BOTH directions, bias folded in (one MXU matmul) ----
    gx = jnp.dot(x2_ref[...], wih_ref[...],
                 preferred_element_type=jnp.float32) + bih_ref[...]        # (S*BP, 8H) f32, vreg-resident
    whh = whh_ref[...]

    h_cat = jnp.zeros((BP, 2 * H), jnp.float32)   # [h_fwd | h_bwd]
    c_cat = jnp.zeros((BP, 2 * H), jnp.float32)   # [c_fwd | c_bwd]

    fwd_h = []   # h_fwd at times 0..S-1
    bwd_h = []   # h_bwd at times S-1..0 (loop order)

    # Fused fwd/bwd recurrence, fully unrolled (S tiny & static).  One recurrent matmul
    # per step for both directions; all per-step tensors are full 8-sublane tiles.
    for t in range(S):
        gates = gx[t * BP:(t + 1) * BP, :] + jnp.dot(
            h_cat.astype(whh.dtype), whh, preferred_element_type=jnp.float32)   # (BP, 8H) f32
        # sigmoid(i,f,o) via a single tanh over the contiguous 6H block; tanh only on g
        sig = jnp.tanh(gates[:, 0:6 * H] * 0.5) * 0.5 + 0.5                      # (BP, 6H)
        g_g = jnp.tanh(gates[:, 6 * H:8 * H])                                    # (BP, 2H) = [g_f | g_b]
        i_g = sig[:, 0:2 * H]
        f_g = sig[:, 2 * H:4 * H]
        o_g = sig[:, 4 * H:6 * H]
        c_cat = f_g * c_cat + i_g * g_g
        h_cat = o_g * jnp.tanh(c_cat)
        fwd_h.append(h_cat[:, 0:H])        # h_fwd(t)
        bwd_h.append(h_cat[:, H:2 * H])    # h_bwd(S-1-t)

    # Reassemble time-ordered hidden slabs in registers (Python list reversal is free at trace time).
    hs_f = jnp.concatenate(fwd_h, axis=0).astype(wtagf_ref.dtype)          # (S*BP, H), time order
    hs_b = jnp.concatenate(bwd_h[::-1], axis=0).astype(wtagb_ref.dtype)    # (S*BP, H), time order

    # hidden2tag: two MXU matmuls onto the lane-dense (S*BP, 128) output -> full unmasked vst
    out_ref[...] = (jnp.dot(hs_f, wtagf_ref[...], preferred_element_type=jnp.float32)
                    + jnp.dot(hs_b, wtagb_ref[...], preferred_element_type=jnp.float32)
                    + btag_ref[...])


def _fuse_gate_cols(m_f, m_b):
    """Per-direction [i,f,g,o] column blocks -> fused [i_f,i_b,f_f,f_b,o_f,o_b,g_f,g_b]."""
    def blk(m, k):
        return m[..., k * H:(k + 1) * H]
    return jnp.concatenate([blk(m_f, 0), blk(m_b, 0),     # i
                            blk(m_f, 1), blk(m_b, 1),     # f
                            blk(m_f, 3), blk(m_b, 3),     # o
                            blk(m_f, 2), blk(m_b, 2)],    # g
                           axis=-1)


def bilstm_hidden2tag(x, params):
    """x: (B, S, D_IN) float32 -> emission scores (B, S, T) float32."""
    # ---- fused / padded weight layout (PyTorch [i,f,g,o], W^T, b_ih+b_hh preserved in params) ----
    zi = jnp.zeros((D_IN, 4 * H), jnp.float32)
    zh = jnp.zeros((H, 4 * H), jnp.float32)
    wih_big = jnp.concatenate([_fuse_gate_cols(params["wih_f"], zi),
                               _fuse_gate_cols(zi, params["wih_b"])],
                              axis=0).astype(jnp.bfloat16)                     # (2*D_IN, 8H)
    whh_big = jnp.concatenate([_fuse_gate_cols(params["whh_f"], zh),
                               _fuse_gate_cols(zh, params["whh_b"])],
                              axis=0).astype(jnp.bfloat16)                     # (2H, 8H)
    b_big = _fuse_gate_cols(params["b_f"], params["b_b"])                      # (1, 8H) f32

    wtag_f = jnp.zeros((H, TPAD), jnp.bfloat16).at[:, :T].set(
        params["wtag"][:H].astype(jnp.bfloat16))
    wtag_b = jnp.zeros((H, TPAD), jnp.bfloat16).at[:, :T].set(
        params["wtag"][H:].astype(jnp.bfloat16))
    btag = jnp.zeros((1, TPAD), jnp.float32).at[:, :T].set(params["btag"])

    # ---- activations: time-major, batch padded to a full 8-sublane tile, bwd half time-reversed ----
    xt = jnp.transpose(x, (1, 0, 2))                       # (S, B, D_IN)
    xt = jnp.pad(xt, ((0, 0), (0, BP - B), (0, 0)))        # (S, BP, D_IN)  zero rows are discarded later
    x2 = jnp.concatenate([xt, xt[::-1]], axis=-1)          # (S, BP, 2*D_IN): [x_t | x_{S-1-t}]
    x2 = x2.reshape(S * BP, 2 * D_IN).astype(jnp.bfloat16)

    # Everything fits comfortably in VMEM/vregs (<<0.1 MiB): no grid, no BlockSpec tiling,
    # no pipelining, no scratch -- the kernel is latency-bound on the serial h-dependency.
    # TODO(synk): on v7x the fwd/bwd chains (or batch halves) could be split across the 2 TensorCores.
    out = pl.pallas_call(
        _bilstm_tag_kernel,
        out_shape=jax.ShapeDtypeStruct((S * BP, TPAD), jnp.float32),
        in_specs=[pl.BlockSpec(memory_space=pltpu.MemorySpace.VMEM)] * 7,
        out_specs=pl.BlockSpec(memory_space=pltpu.MemorySpace.VMEM),
    )(x2, wih_big, b_big, whh_big, wtag_f, wtag_b, btag)

    tags = out.reshape(S, BP, TPAD)[:, :B, :T]             # drop batch/lane padding (free XLA-side)
    return jnp.transpose(tags, (1, 0, 2))                  # (B, S, T)


# =======================  CRF viterbi decode (plain JAX glue)  =======================
# Tiny tag dim (T=12) recurrence + backtrack; not the matmul hot path.
# TODO(synk): fold the embedding gather + viterbi decode into the same pallas_call and batch many
#             sequences per call to amortize launch/DMA overhead (shapes kept small for this demo).
# TODO(synk): general padding-mask handling in viterbi omitted; example uses full-length mask.
def viterbi_decode(tags, transitions):
    # tags: (B, S, T) emission scores ; transitions[prev, cur]
    feats = jnp.transpose(tags, (1, 0, 2))                    # (S, B, T)
    partition0 = feats[0] + transitions[START_TAG][None, :]   # (B, T)

    def step(partition, feat_t):
        # cur[b, prev, cur] = feat_t[b, cur] + trans[prev, cur] + partition[b, prev]
        cur = feat_t[:, None, :] + transitions[None, :, :] + partition[:, :, None]
        new_part = jnp.max(cur, axis=1)
        bp = jnp.argmax(cur, axis=1).astype(jnp.int32)
        return new_part, bp

    partition, bps = lax.scan(step, partition0, feats[1:])    # bps: (S-1, B, T)

    last_values = partition[:, :, None] + transitions[None, :, :]
    last_bp = jnp.argmax(last_values, axis=1).astype(jnp.int32)  # (B, T)
    pointer = last_bp[:, STOP_TAG]                               # (B,)

    def back_step(ptr, bp_t):
        new_ptr = jnp.take_along_axis(bp_t, ptr[:, None], axis=1)[:, 0]
        return new_ptr, new_ptr

    _, rev_decoded = lax.scan(back_step, pointer, bps, reverse=True)  # (S-1, B)
    decode = jnp.concatenate([rev_decoded, pointer[None, :]], axis=0)  # (S, B)
    return jnp.transpose(decode, (1, 0))                               # (B, S)


# =======================  parameter init (deterministic, synthetic)  =======================
def init_params(key):
    keys = jax.random.split(key, 13)

    def u(k, shape, scale):
        return jax.random.uniform(k, shape, jnp.float32, -scale, scale)

    word_emb = jax.random.normal(keys[0], (WORD_VOCAB, WORD_EMB), jnp.float32) * 0.1
    word_emb = word_emb.at[0].set(0.0)       # padding_idx=0
    biword_emb = jax.random.normal(keys[1], (BIWORD_VOCAB, BIWORD_EMB), jnp.float32) * 0.1
    biword_emb = biword_emb.at[0].set(0.0)   # padding_idx=0

    s = 1.0 / (H ** 0.5)
    wih_f = u(keys[2], (D_IN, 4 * H), s)
    whh_f = u(keys[3], (H, 4 * H), s)
    b_f = u(keys[4], (1, 4 * H), s) + u(keys[5], (1, 4 * H), s)     # b_ih + b_hh
    wih_b = u(keys[6], (D_IN, 4 * H), s)
    whh_b = u(keys[7], (H, 4 * H), s)
    b_b = u(keys[8], (1, 4 * H), s) + u(keys[9], (1, 4 * H), s)

    st = 1.0 / ((2 * H) ** 0.5)
    wtag = u(keys[10], (2 * H, T), st)
    btag = u(keys[11], (1, T), st)

    trans = jax.random.normal(keys[12], (T, T), jnp.float32) * 0.1
    trans = trans.at[:, START_TAG].set(-10000.0)   # nothing transitions into START
    trans = trans.at[STOP_TAG, :].set(-10000.0)    # nothing transitions out of STOP

    return dict(word_emb=word_emb, biword_emb=biword_emb,
                wih_f=wih_f, whh_f=whh_f, b_f=b_f,
                wih_b=wih_b, whh_b=whh_b, b_b=b_b,
                wtag=wtag, btag=btag, transitions=trans)


# =======================  forward  =======================
@jax.jit
def gaz_lstm_forward(params, word_inputs, biword_inputs, mask):
    # embedding lookup + concat (glue)
    word_embs = params["word_emb"][word_inputs]              # (B, S, WORD_EMB)
    biword_embs = params["biword_emb"][biword_inputs]        # (B, S, BIWORD_EMB)
    x = jnp.concatenate([word_embs, biword_embs], axis=-1)   # (B, S, D_IN)
    # nn.Dropout in eval mode == identity
    # TODO(synk): padding mask is ignored in the BiLSTM/viterbi; demo uses full-length mask.
    tags = bilstm_hidden2tag(x.astype(jnp.float32), params)  # (B, S, T)  -- Pallas kernel
    tag_seq = viterbi_decode(tags, params["transitions"])    # (B, S)
    return tag_seq


if __name__ == "__main__":
    key = jax.random.PRNGKey(0)
    pkey, k1, k2 = jax.random.split(key, 3)
    params = init_params(pkey)

    # non-zero ids => mask is all ones (full-length sequences)
    word_inputs = jax.random.randint(k1, (B, S), 1, WORD_VOCAB, dtype=jnp.int32)
    biword_inputs = jax.random.randint(k2, (B, S), 1, BIWORD_VOCAB, dtype=jnp.int32)
    mask = jnp.ones((B, S), dtype=jnp.int32)

    tag_seq = gaz_lstm_forward(params, word_inputs, biword_inputs, mask)
    tag_seq = jax.block_until_ready(tag_seq)
    assert tag_seq.shape == (B, S)
    print("KERNEL_OK")
</pallas_src>

<mosaic_0001>
module attributes {stable_mosaic.version = 11 : i64} {
  func.func @_bilstm_tag_kernel(%arg0: memref<64x96xbf16, #tpu.memory_space<vmem>>, %arg1: memref<96x256xbf16, #tpu.memory_space<vmem>>, %arg2: memref<1x256xf32, #tpu.memory_space<vmem>>, %arg3: memref<64x256xbf16, #tpu.memory_space<vmem>>, %arg4: memref<32x128xbf16, #tpu.memory_space<vmem>>, %arg5: memref<32x128xbf16, #tpu.memory_space<vmem>>, %arg6: memref<1x128xf32, #tpu.memory_space<vmem>>, %arg7: memref<64x128xf32, #tpu.memory_space<vmem>>) attributes {dimension_semantics = [], scalar_prefetch = 0 : i64, scratch_operands = 0 : i64, tpu.core_type = #tpu.core_type<tc>} {
    %c0 = arith.constant 0 : index
    %c0_0 = arith.constant 0 : index
    %0 = vector.load %arg0[%c0, %c0_0] : memref<64x96xbf16, #tpu.memory_space<vmem>>, vector<64x96xbf16>
    %c0_1 = arith.constant 0 : index
    %c0_2 = arith.constant 0 : index
    %1 = vector.load %arg1[%c0_1, %c0_2] : memref<96x256xbf16, #tpu.memory_space<vmem>>, vector<96x256xbf16>
    %cst = arith.constant dense<0.000000e+00> : vector<64x256xf32>
    %2 = tpu.matmul %0, %1, %cst {dimension_numbers = #tpu.dot_dimension_numbers<[1], [0], [0], [1], [0, 0, 1, 1], [], []>} : vector<64x96xbf16>, vector<96x256xbf16>, vector<64x256xf32> -> vector<64x256xf32>
    %c0_3 = arith.constant 0 : index
    %c0_4 = arith.constant 0 : index
    %3 = vector.load %arg2[%c0_3, %c0_4] : memref<1x256xf32, #tpu.memory_space<vmem>>, vector<1x256xf32>
    %4 = vector.broadcast %3 : vector<1x256xf32> to vector<64x256xf32>
    %5 = arith.addf %2, %4 : vector<64x256xf32>
    %c0_5 = arith.constant 0 : index
    %c0_6 = arith.constant 0 : index
    %6 = vector.load %arg3[%c0_5, %c0_6] : memref<64x256xbf16, #tpu.memory_space<vmem>>, vector<64x256xbf16>
    %cst_7 = arith.constant 0.000000e+00 : f32
    %7 = vector.broadcast %cst_7 : f32 to vector<8x64xf32>
    %cst_8 = arith.constant 0.000000e+00 : f32
    %8 = vector.broadcast %cst_8 : f32 to vector<8x64xf32>
    %9 = vector.extract_strided_slice %5 {offsets = [0, 0], sizes = [8, 256], strides = [1, 1]} : vector<64x256xf32> to vector<8x256xf32>
    %10 = arith.truncf %7 : vector<8x64xf32> to vector<8x64xbf16>
    %cst_9 = arith.constant dense<0.000000e+00> : vector<8x256xf32>
    %11 = tpu.matmul %10, %6, %cst_9 {dimension_numbers = #tpu.dot_dimension_numbers<[1], [0], [0], [1], [0, 0, 1, 1], [], []>} : vector<8x64xbf16>, vector<64x256xbf16>, vector<8x256xf32> -> vector<8x256xf32>
    %12 = arith.addf %9, %11 : vector<8x256xf32>
    %13 = vector.extract_strided_slice %12 {offsets = [0, 0], sizes = [8, 192], strides = [1, 1]} : vector<8x256xf32> to vector<8x192xf32>
    %cst_10 = arith.constant 5.000000e-01 : f32
    %14 = vector.broadcast %cst_10 : f32 to vector<8x192xf32>
    %15 = arith.mulf %13, %14 : vector<8x192xf32>
    %16 = math.tanh %15 : vector<8x192xf32>
    %cst_11 = arith.constant 5.000000e-01 : f32
    %17 = vector.broadcast %cst_11 : f32 to vector<8x192xf32>
    %18 = arith.mulf %16, %17 : vector<8x192xf32>
    %cst_12 = arith.constant 5.000000e-01 : f32
    %19 = vector.broadcast %cst_12 : f32 to vector<8x192xf32>
    %20 = arith.addf %18, %19 : vector<8x192xf32>
    %21 = vector.extract_strided_slice %12 {offsets = [0, 192], sizes = [8, 64], strides = [1, 1]} : vector<8x256xf32> to vector<8x64xf32>
    %22 = math.tanh %21 : vector<8x64xf32>
    %23 = vector.extract_strided_slice %20 {offsets = [0, 0], sizes = [8, 64], strides = [1, 1]} : vector<8x192xf32> to vector<8x64xf32>
    %24 = vector.extract_strided_slice %20 {offsets = [0, 64], sizes = [8, 64], strides = [1, 1]} : vector<8x192xf32> to vector<8x64xf32>
    %25 = vector.extract_strided_slice %20 {offsets = [0, 128], sizes = [8, 64], strides = [1, 1]} : vector<8x192xf32> to vector<8x64xf32>
    %26 = arith.mulf %24, %8 : vector<8x64xf32>
    %27 = arith.mulf %23, %22 : vector<8x64xf32>
    %28 = arith.addf %26, %27 : vector<8x64xf32>
    %29 = math.tanh %28 : vector<8x64xf32>
    %30 = arith.mulf %25, %29 : vector<8x64xf32>
    %31 = vector.extract_strided_slice %30 {offsets = [0, 0], sizes = [8, 32], strides = [1, 1]} : vector<8x64xf32> to vector<8x32xf32>
    %32 = vector.extract_strided_slice %30 {offsets = [0, 32], sizes = [8, 32], strides = [1, 1]} : vector<8x64xf32> to vector<8x32xf32>
    %33 = vector.extract_strided_slice %5 {offsets = [8, 0], sizes = [8, 256], strides = [1, 1]} : vector<64x256xf32> to vector<8x256xf32>
    %34 = arith.truncf %30 : vector<8x64xf32> to vector<8x64xbf16>
    %cst_13 = arith.constant dense<0.000000e+00> : vector<8x256xf32>
    %35 = tpu.matmul %34, %6, %cst_13 {dimension_numbers = #tpu.dot_dimension_numbers<[1], [0], [0], [1], [0, 0, 1, 1], [], []>} : vector<8x64xbf16>, vector<64x256xbf16>, vector<8x256xf32> -> vector<8x256xf32>
    %36 = arith.addf %33, %35 : vector<8x256xf32>
    %37 = vector.extract_strided_slice %36 {offsets = [0, 0], sizes = [8, 192], strides = [1, 1]} : vector<8x256xf32> to vector<8x192xf32>
    %cst_14 = arith.constant 5.000000e-01 : f32
    %38 = vector.broadcast %cst_14 : f32 to vector<8x192xf32>
    %39 = arith.mulf %37, %38 : vector<8x192xf32>
    %40 = math.tanh %39 : vector<8x192xf32>
    %cst_15 = arith.constant 5.000000e-01 : f32
    %41 = vector.broadcast %cst_15 : f32 to vector<8x192xf32>
    %42 = arith.mulf %40, %41 : vector<8x192xf32>
    %cst_16 = arith.constant 5.000000e-01 : f32
    %43 = vector.broadcast %cst_16 : f32 to vector<8x192xf32>
    %44 = arith.addf %42, %43 : vector<8x192xf32>
    %45 = vector.extract_strided_slice %36 {offsets = [0, 192], sizes = [8, 64], strides = [1, 1]} : vector<8x256xf32> to vector<8x64xf32>
    %46 = math.tanh %45 : vector<8x64xf32>
    %47 = vector.extract_strided_slice %44 {offsets = [0, 0], sizes = [8, 64], strides = [1, 1]} : vector<8x192xf32> to vector<8x64xf32>
    %48 = vector.extract_strided_slice %44 {offsets = [0, 64], sizes = [8, 64], strides = [1, 1]} : vector<8x192xf32> to vector<8x64xf32>
    %49 = vector.extract_strided_slice %44 {offsets = [0, 128], sizes = [8, 64], strides = [1, 1]} : vector<8x192xf32> to vector<8x64xf32>
    %50 = arith.mulf %48, %28 : vector<8x64xf32>
    %51 = arith.mulf %47, %46 : vector<8x64xf32>
    %52 = arith.addf %50, %51 : vector<8x64xf32>
    %53 = math.tanh %52 : vector<8x64xf32>
    %54 = arith.mulf %49, %53 : vector<8x64xf32>
    %55 = vector.extract_strided_slice %54 {offsets = [0, 0], sizes = [8, 32], strides = [1, 1]} : vector<8x64xf32> to vector<8x32xf32>
    %56 = vector.extract_strided_slice %54 {offsets = [0, 32], sizes = [8, 32], strides = [1, 1]} : vector<8x64xf32> to vector<8x32xf32>
    %57 = vector.extract_strided_slice %5 {offsets = [16, 0], sizes = [8, 256], strides = [1, 1]} : vector<64x256xf32> to vector<8x256xf32>
    %58 = arith.truncf %54 : vector<8x64xf32> to vector<8x64xbf16>
    %cst_17 = arith.constant dense<0.000000e+00> : vector<8x256xf32>
    %59 = tpu.matmul %58, %6, %cst_17 {dimension_numbers = #tpu.dot_dimension_numbers<[1], [0], [0], [1], [0, 0, 1, 1], [], []>} : vector<8x64xbf16>, vector<64x256xbf16>, vector<8x256xf32> -> vector<8x256xf32>
    %60 = arith.addf %57, %59 : vector<8x256xf32>
    %61 = vector.extract_strided_slice %60 {offsets = [0, 0], sizes = [8, 192], strides = [1, 1]} : vector<8x256xf32> to vector<8x192xf32>
    %cst_18 = arith.constant 5.000000e-01 : f32
    %62 = vector.broadcast %cst_18 : f32 to vector<8x192xf32>
    %63 = arith.mulf %61, %62 : vector<8x192xf32>
    %64 = math.tanh %63 : vector<8x192xf32>
    %cst_19 = arith.constant 5.000000e-01 : f32
    %65 = vector.broadcast %cst_19 : f32 to vector<8x192xf32>
    %66 = arith.mulf %64, %65 : vector<8x192xf32>
    %cst_20 = arith.constant 5.000000e-01 : f32
    %67 = vector.broadcast %cst_20 : f32 to vector<8x192xf32>
    %68 = arith.addf %66, %67 : vector<8x192xf32>
    %69 = vector.extract_strided_slice %60 {offsets = [0, 192], sizes = [8, 64], strides = [1, 1]} : vector<8x256xf32> to vector<8x64xf32>
    %70 = math.tanh %69 : vector<8x64xf32>
    %71 = vector.extract_strided_slice %68 {offsets = [0, 0], sizes = [8, 64], strides = [1, 1]} : vector<8x192xf32> to vector<8x64xf32>
    %72 = vector.extract_strided_slice %68 {offsets = [0, 64], sizes = [8, 64], strides = [1, 1]} : vector<8x192xf32> to vector<8x64xf32>
    %73 = vector.extract_strided_slice %68 {offsets = [0, 128], sizes = [8, 64], strides = [1, 1]} : vector<8x192xf32> to vector<8x64xf32>
    %74 = arith.mulf %72, %52 : vector<8x64xf32>
    %75 = arith.mulf %71, %70 : vector<8x64xf32>
    %76 = arith.addf %74, %75 : vector<8x64xf32>
    %77 = math.tanh %76 : vector<8x64xf32>
    %78 = arith.mulf %73, %77 : vector<8x64xf32>
    %79 = vector.extract_strided_slice %78 {offsets = [0, 0], sizes = [8, 32], strides = [1, 1]} : vector<8x64xf32> to vector<8x32xf32>
    %80 = vector.extract_strided_slice %78 {offsets = [0, 32], sizes = [8, 32], strides = [1, 1]} : vector<8x64xf32> to vector<8x32xf32>
    %81 = vector.extract_strided_slice %5 {offsets = [24, 0], sizes = [8, 256], strides = [1, 1]} : vector<64x256xf32> to vector<8x256xf32>
    %82 = arith.truncf %78 : vector<8x64xf32> to vector<8x64xbf16>
    %cst_21 = arith.constant dense<0.000000e+00> : vector<8x256xf32>
    %83 = tpu.matmul %82, %6, %cst_21 {dimension_numbers = #tpu.dot_dimension_numbers<[1], [0], [0], [1], [0, 0, 1, 1], [], []>} : vector<8x64xbf16>, vector<64x256xbf16>, vector<8x256xf32> -> vector<8x256xf32>
    %84 = arith.addf %81, %83 : vector<8x256xf32>
    %85 = vector.extract_strided_slice %84 {offsets = [0, 0], sizes = [8, 192], strides = [1, 1]} : vector<8x256xf32> to vector<8x192xf32>
    %cst_22 = arith.constant 5.000000e-01 : f32
    %86 = vector.broadcast %cst_22 : f32 to vector<8x192xf32>
    %87 = arith.mulf %85, %86 : vector<8x192xf32>
    %88 = math.tanh %87 : vector<8x192xf32>
    %cst_23 = arith.constant 5.000000e-01 : f32
    %89 = vector.broadcast %cst_23 : f32 to vector<8x192xf32>
    %90 = arith.mulf %88, %89 : vector<8x192xf32>
    %cst_24 = arith.constant 5.000000e-01 : f32
    %91 = vector.broadcast %cst_24 : f32 to vector<8x192xf32>
    %92 = arith.addf %90, %91 : vector<8x192xf32>
    %93 = vector.extract_strided_slice %84 {offsets = [0, 192], sizes = [8, 64], strides = [1, 1]} : vector<8x256xf32> to vector<8x64xf32>
    %94 = math.tanh %93 : vector<8x64xf32>
    %95 = vector.extract_strided_slice %92 {offsets = [0, 0], sizes = [8, 64], strides = [1, 1]} : vector<8x192xf32> to vector<8x64xf32>
    %96 = vector.extract_strided_slice %92 {offsets = [0, 64], sizes = [8, 64], strides = [1, 1]} : vector<8x192xf32> to vector<8x64xf32>
    %97 = vector.extract_strided_slice %92 {offsets = [0, 128], sizes = [8, 64], strides = [1, 1]} : vector<8x192xf32> to vector<8x64xf32>
    %98 = arith.mulf %96, %76 : vector<8x64xf32>
    %99 = arith.mulf %95, %94 : vector<8x64xf32>
    %100 = arith.addf %98, %99 : vector<8x64xf32>
    %101 = math.tanh %100 : vector<8x64xf32>
    %102 = arith.mulf %97, %101 : vector<8x64xf32>
    %103 = vector.extract_strided_slice %102 {offsets = [0, 0], sizes = [8, 32], strides = [1, 1]} : vector<8x64xf32> to vector<8x32xf32>
    %104 = vector.extract_strided_slice %102 {offsets = [0, 32], sizes = [8, 32], strides = [1, 1]} : vector<8x64xf32> to vector<8x32xf32>
    %105 = vector.extract_strided_slice %5 {offsets = [32, 0], sizes = [8, 256], strides = [1, 1]} : vector<64x256xf32> to vector<8x256xf32>
    %106 = arith.truncf %102 : vector<8x64xf32> to vector<8x64xbf16>
    %cst_25 = arith.constant dense<0.000000e+00> : vector<8x256xf32>
    %107 = tpu.matmul %106, %6, %cst_25 {dimension_numbers = #tpu.dot_dimension_numbers<[1], [0], [0], [1], [0, 0, 1, 1], [], []>} : vector<8x64xbf16>, vector<64x256xbf16>, vector<8x256xf32> -> vector<8x256xf32>
    %108 = arith.addf %105, %107 : vector<8x256xf32>
    %109 = vector.extract_strided_slice %108 {offsets = [0, 0], sizes = [8, 192], strides = [1, 1]} : vector<8x256xf32> to vector<8x192xf32>
    %cst_26 = arith.constant 5.000000e-01 : f32
    %110 = vector.broadcast %cst_26 : f32 to vector<8x192xf32>
    %111 = arith.mulf %109, %110 : vector<8x192xf32>
    %112 = math.tanh %111 : vector<8x192xf32>
    %cst_27 = arith.constant 5.000000e-01 : f32
    %113 = vector.broadcast %cst_27 : f32 to vector<8x192xf32>
    %114 = arith.mulf %112, %113 : vector<8x192xf32>
    %cst_28 = arith.constant 5.000000e-01 : f32
    %115 = vector.broadcast %cst_28 : f32 to vector<8x192xf32>
    %116 = arith.addf %114, %115 : vector<8x192xf32>
    %117 = vector.extract_strided_slice %108 {offsets = [0, 192], sizes = [8, 64], strides = [1, 1]} : vector<8x256xf32> to vector<8x64xf32>
    %118 = math.tanh %117 : vector<8x64xf32>
    %119 = vector.extract_strided_slice %116 {offsets = [0, 0], sizes = [8, 64], strides = [1, 1]} : vector<8x192xf32> to vector<8x64xf32>
    %120 = vector.extract_strided_slice %116 {offsets = [0, 64], sizes = [8, 64], strides = [1, 1]} : vector<8x192xf32> to vector<8x64xf32>
    %121 = vector.extract_strided_slice %116 {offsets = [0, 128], sizes = [8, 64], strides = [1, 1]} : vector<8x192xf32> to vector<8x64xf32>
    %122 = arith.mulf %120, %100 : vector<8x64xf32>
    %123 = arith.mulf %119, %118 : vector<8x64xf32>
    %124 = arith.addf %122, %123 : vector<8x64xf32>
    %125 = math.tanh %124 : vector<8x64xf32>
    %126 = arith.mulf %121, %125 : vector<8x64xf32>
    %127 = vector.extract_strided_slice %126 {offsets = [0, 0], sizes = [8, 32], strides = [1, 1]} : vector<8x64xf32> to vector<8x32xf32>
    %128 = vector.extract_strided_slice %126 {offsets = [0, 32], sizes = [8, 32], strides = [1, 1]} : vector<8x64xf32> to vector<8x32xf32>
    %129 = vector.extract_strided_slice %5 {offsets = [40, 0], sizes = [8, 256], strides = [1, 1]} : vector<64x256xf32> to vector<8x256xf32>
    %130 = arith.truncf %126 : vector<8x64xf32> to vector<8x64xbf16>
    %cst_29 = arith.constant dense<0.000000e+00> : vector<8x256xf32>
    %131 = tpu.matmul %130, %6, %cst_29 {dimension_numbers = #tpu.dot_dimension_numbers<[1], [0], [0], [1], [0, 0, 1, 1], [], []>} : vector<8x64xbf16>, vector<64x256xbf16>, vector<8x256xf32> -> vector<8x256xf32>
    %132 = arith.addf %129, %131 : vector<8x256xf32>
    %133 = vector.extract_strided_slice %132 {offsets = [0, 0], sizes = [8, 192], strides = [1, 1]} : vector<8x256xf32> to vector<8x192xf32>
    %cst_30 = arith.constant 5.000000e-01 : f32
    %134 = vector.broadcast %cst_30 : f32 to vector<8x192xf32>
    %135 = arith.mulf %133, %134 : vector<8x192xf32>
    %136 = math.tanh %135 : vector<8x192xf32>
    %cst_31 = arith.constant 5.000000e-01 : f32
    %137 = vector.broadcast %cst_31 : f32 to vector<8x192xf32>
    %138 = arith.mulf %136, %137 : vector<8x192xf32>
    %cst_32 = arith.constant 5.000000e-01 : f32
    %139 = vector.broadcast %cst_32 : f32 to vector<8x192xf32>
    %140 = arith.addf %138, %139 : vector<8x192xf32>
    %141 = vector.extract_strided_slice %132 {offsets = [0, 192], sizes = [8, 64], strides = [1, 1]} : vector<8x256xf32> to vector<8x64xf32>
    %142 = math.tanh %141 : vector<8x64xf32>
    %143 = vector.extract_strided_slice %140 {offsets = [0, 0], sizes = [8, 64], strides = [1, 1]} : vector<8x192xf32> to vector<8x64xf32>
    %144 = vector.extract_strided_slice %140 {offsets = [0, 64], sizes = [8, 64], strides = [1, 1]} : vector<8x192xf32> to vector<8x64xf32>
    %145 = vector.extract_strided_slice %140 {offsets = [0, 128], sizes = [8, 64], strides = [1, 1]} : vector<8x192xf32> to vector<8x64xf32>
    %146 = arith.mulf %144, %124 : vector<8x64xf32>
    %147 = arith.mulf %143, %142 : vector<8x64xf32>
    %148 = arith.addf %146, %147 : vector<8x64xf32>
    %149 = math.tanh %148 : vector<8x64xf32>
    %150 = arith.mulf %145, %149 : vector<8x64xf32>
    %151 = vector.extract_strided_slice %150 {offsets = [0, 0], sizes = [8, 32], strides = [1, 1]} : vector<8x64xf32> to vector<8x32xf32>
    %152 = vector.extract_strided_slice %150 {offsets = [0, 32], sizes = [8, 32], strides = [1, 1]} : vector<8x64xf32> to vector<8x32xf32>
    %153 = vector.extract_strided_slice %5 {offsets = [48, 0], sizes = [8, 256], strides = [1, 1]} : vector<64x256xf32> to vector<8x256xf32>
    %154 = arith.truncf %150 : vector<8x64xf32> to vector<8x64xbf16>
    %cst_33 = arith.constant dense<0.000000e+00> : vector<8x256xf32>
    %155 = tpu.matmul %154, %6, %cst_33 {dimension_numbers = #tpu.dot_dimension_numbers<[1], [0], [0], [1], [0, 0, 1, 1], [], []>} : vector<8x64xbf16>, vector<64x256xbf16>, vector<8x256xf32> -> vector<8x256xf32>
    %156 = arith.addf %153, %155 : vector<8x256xf32>
    %157 = vector.extract_strided_slice %156 {offsets = [0, 0], sizes = [8, 192], strides = [1, 1]} : vector<8x256xf32> to vector<8x192xf32>
    %cst_34 = arith.constant 5.000000e-01 : f32
    %158 = vector.broadcast %cst_34 : f32 to vector<8x192xf32>
    %159 = arith.mulf %157, %158 : vector<8x192xf32>
    %160 = math.tanh %159 : vector<8x192xf32>
    %cst_35 = arith.constant 5.000000e-01 : f32
    %161 = vector.broadcast %cst_35 : f32 to vector<8x192xf32>
    %162 = arith.mulf %160, %161 : vector<8x192xf32>
    %cst_36 = arith.constant 5.000000e-01 : f32
    %163 = vector.broadcast %cst_36 : f32 to vector<8x192xf32>
    %164 = arith.addf %162, %163 : vector<8x192xf32>
    %165 = vector.extract_strided_slice %156 {offsets = [0, 192], sizes = [8, 64], strides = [1, 1]} : vector<8x256xf32> to vector<8x64xf32>
    %166 = math.tanh %165 : vector<8x64xf32>
    %167 = vector.extract_strided_slice %164 {offsets = [0, 0], sizes = [8, 64], strides = [1, 1]} : vector<8x192xf32> to vector<8x64xf32>
    %168 = vector.extract_strided_slice %164 {offsets = [0, 64], sizes = [8, 64], strides = [1, 1]} : vector<8x192xf32> to vector<8x64xf32>
    %169 = vector.extract_strided_slice %164 {offsets = [0, 128], sizes = [8, 64], strides = [1, 1]} : vector<8x192xf32> to vector<8x64xf32>
    %170 = arith.mulf %168, %148 : vector<8x64xf32>
    %171 = arith.mulf %167, %166 : vector<8x64xf32>
    %172 = arith.addf %170, %171 : vector<8x64xf32>
    %173 = math.tanh %172 : vector<8x64xf32>
    %174 = arith.mulf %169, %173 : vector<8x64xf32>
    %175 = vector.extract_strided_slice %174 {offsets = [0, 0], sizes = [8, 32], strides = [1, 1]} : vector<8x64xf32> to vector<8x32xf32>
    %176 = vector.extract_strided_slice %174 {offsets = [0, 32], sizes = [8, 32], strides = [1, 1]} : vector<8x64xf32> to vector<8x32xf32>
    %177 = vector.extract_strided_slice %5 {offsets = [56, 0], sizes = [8, 256], strides = [1, 1]} : vector<64x256xf32> to vector<8x256xf32>
    %178 = arith.truncf %174 : vector<8x64xf32> to vector<8x64xbf16>
    %cst_37 = arith.constant dense<0.000000e+00> : vector<8x256xf32>
    %179 = tpu.matmul %178, %6, %cst_37 {dimension_numbers = #tpu.dot_dimension_numbers<[1], [0], [0], [1], [0, 0, 1, 1], [], []>} : vector<8x64xbf16>, vector<64x256xbf16>, vector<8x256xf32> -> vector<8x256xf32>
    %180 = arith.addf %177, %179 : vector<8x256xf32>
    %181 = vector.extract_strided_slice %180 {offsets = [0, 0], sizes = [8, 192], strides = [1, 1]} : vector<8x256xf32> to vector<8x192xf32>
    %cst_38 = arith.constant 5.000000e-01 : f32
    %182 = vector.broadcast %cst_38 : f32 to vector<8x192xf32>
    %183 = arith.mulf %181, %182 : vector<8x192xf32>
    %184 = math.tanh %183 : vector<8x192xf32>
    %cst_39 = arith.constant 5.000000e-01 : f32
    %185 = vector.broadcast %cst_39 : f32 to vector<8x192xf32>
    %186 = arith.mulf %184, %185 : vector<8x192xf32>
    %cst_40 = arith.constant 5.000000e-01 : f32
    %187 = vector.broadcast %cst_40 : f32 to vector<8x192xf32>
    %188 = arith.addf %186, %187 : vector<8x192xf32>
    %189 = vector.extract_strided_slice %180 {offsets = [0, 192], sizes = [8, 64], strides = [1, 1]} : vector<8x256xf32> to vector<8x64xf32>
    %190 = math.tanh %189 : vector<8x64xf32>
    %191 = vector.extract_strided_slice %188 {offsets = [0, 0], sizes = [8, 64], strides = [1, 1]} : vector<8x192xf32> to vector<8x64xf32>
    %192 = vector.extract_strided_slice %188 {offsets = [0, 64], sizes = [8, 64], strides = [1, 1]} : vector<8x192xf32> to vector<8x64xf32>
    %193 = vector.extract_strided_slice %188 {offsets = [0, 128], sizes = [8, 64], strides = [1, 1]} : vector<8x192xf32> to vector<8x64xf32>
    %194 = arith.mulf %192, %172 : vector<8x64xf32>
    %195 = arith.mulf %191, %190 : vector<8x64xf32>
    %196 = arith.addf %194, %195 : vector<8x64xf32>
    %197 = math.tanh %196 : vector<8x64xf32>
    %198 = arith.mulf %193, %197 : vector<8x64xf32>
    %199 = vector.extract_strided_slice %198 {offsets = [0, 0], sizes = [8, 32], strides = [1, 1]} : vector<8x64xf32> to vector<8x32xf32>
    %200 = vector.extract_strided_slice %198 {offsets = [0, 32], sizes = [8, 32], strides = [1, 1]} : vector<8x64xf32> to vector<8x32xf32>
    %201 = tpu.concatenate %31, %55, %79, %103, %127, %151, %175, %199 in 0 : vector<8x32xf32>, vector<8x32xf32>, vector<8x32xf32>, vector<8x32xf32>, vector<8x32xf32>, vector<8x32xf32>, vector<8x32xf32>, vector<8x32xf32> -> vector<64x32xf32>
    %202 = arith.truncf %201 : vector<64x32xf32> to vector<64x32xbf16>
    %203 = tpu.concatenate %200, %176, %152, %128, %104, %80, %56, %32 in 0 : vector<8x32xf32>, vector<8x32xf32>, vector<8x32xf32>, vector<8x32xf32>, vector<8x32xf32>, vector<8x32xf32>, vector<8x32xf32>, vector<8x32xf32> -> vector<64x32xf32>
    %204 = arith.truncf %203 : vector<64x32xf32> to vector<64x32xbf16>
    %c0_41 = arith.constant 0 : index
    %c0_42 = arith.constant 0 : index
    %205 = vector.load %arg4[%c0_41, %c0_42] : memref<32x128xbf16, #tpu.memory_space<vmem>>, vector<32x128xbf16>
    %cst_43 = arith.constant dense<0.000000e+00> : vector<64x128xf32>
    %206 = tpu.matmul %202, %205, %cst_43 {dimension_numbers = #tpu.dot_dimension_numbers<[1], [0], [0], [1], [0, 0, 1, 1], [], []>} : vector<64x32xbf16>, vector<32x128xbf16>, vector<64x128xf32> -> vector<64x128xf32>
    %c0_44 = arith.constant 0 : index
    %c0_45 = arith.constant 0 : index
    %207 = vector.load %arg5[%c0_44, %c0_45] : memref<32x128xbf16, #tpu.memory_space<vmem>>, vector<32x128xbf16>
    %cst_46 = arith.constant dense<0.000000e+00> : vector<64x128xf32>
    %208 = tpu.matmul %204, %207, %cst_46 {dimension_numbers = #tpu.dot_dimension_numbers<[1], [0], [0], [1], [0, 0, 1, 1], [], []>} : vector<64x32xbf16>, vector<32x128xbf16>, vector<64x128xf32> -> vector<64x128xf32>
    %209 = arith.addf %206, %208 : vector<64x128xf32>
    %c0_47 = arith.constant 0 : index
    %c0_48 = arith.constant 0 : index
    %210 = vector.load %arg6[%c0_47, %c0_48] : memref<1x128xf32, #tpu.memory_space<vmem>>, vector<1x128xf32>
    %211 = vector.broadcast %210 : vector<1x128xf32> to vector<64x128xf32>
    %212 = arith.addf %209, %211 : vector<64x128xf32>
    %c0_49 = arith.constant 0 : index
    %c0_50 = arith.constant 0 : index
    %213 = vector.load %arg7[%c0_49, %c0_50] : memref<64x128xf32, #tpu.memory_space<vmem>>, vector<64x128xf32>
    tpu.vector_store %arg7[%c0_49, %c0_50], %212 {strides = array<i32>} : memref<64x128xf32, #tpu.memory_space<vmem>>, vector<64x128xf32>,
    return
  }
}

</mosaic_0001>

<bundles_post_ra>
// kernel: custom-call.6
= control target key start
LH: loop header
LB: loop body
LE: loop exit
PB: predicated region body
PF: predicated region fallthrough
CT: control target
= control target key end

     0   :  { %s6_s0 = inlined_call_operand.vmem [shape: s32[7,2,12], index: 0, kind: output, shape index: {}]  }

// kernel: gaz_lstm_forward.1
= control target key start
LH: loop header
LB: loop body
LE: loop exit
PB: predicated region body
PF: predicated region fallthrough
CT: control target
= control target key end

     0   :  { %v1288_v1 = vmov 0   ;;  %vm139_vm0 = vcmask 785408   ;;  %v49_v25 = vlaneseq  ;;  %vm273_vm1 = vcmask 523264   ;;  %s1290_s29 = smov 96   ;;  %s1665_s1 = inlined_call_operand.vmem [shape: bf16[96,256], index: 1, kind: input, shape index: {}]   ;;  %s1666_s3 = inlined_call_operand.vmem [shape: bf16[64,256], index: 3, kind: input, shape index: {}]   ;;  %s1667_s0 = inlined_call_operand.vmem [shape: bf16[64,96], index: 0, kind: input, shape index: {}]   ;;  %s1668_s2 = inlined_call_operand.vmem [shape: f32[1,256], index: 2, kind: input, shape index: {}]   ;;  %s1669_s5 = inlined_call_operand.vmem [shape: bf16[32,128], index: 5, kind: input, shape index: {}]   ;;  %s1670_s4 = inlined_call_operand.vmem [shape: bf16[32,128], index: 4, kind: input, shape index: {}]   ;;  %s1671_s6 = inlined_call_operand.vmem [shape: f32[1,128], index: 6, kind: input, shape index: {}]   ;;  %s1672_s7 = inlined_call_operand.vmem [shape: f32[64,128], index: 7, kind: output, shape index: {}]  }
   0x1   :  { %v1186_v0 = vld [vmem:[%s1665_s1 + $0x4] ss:$8 sps:$4 sm:$0xff]   ;;  %184 = vmatprep.mubr.bf16.mxu0 %v1288_v1  ;;  %382 = vmatprep.mubr.bf16.mxu1 %v1288_v1  ;;  %v1188_v2 = vld [vmem:[%s1665_s1] ss:$8 sps:$4 sm:$0xff]   ;;  %v1189_v3 = vld [vmem:[%s1665_s1 + $0x14] ss:$8 sps:$4 sm:$0xff]  }
   0x2   :  { %152 = vmatprep.subr.bf16.mxu0 %v1186_v0  ;;  %v1191_v4 = vld [vmem:[%s1665_s1 + $0x10] ss:$8 sps:$4 sm:$0xff]   ;;  %v1192_v5 = vld [vmem:[%s1665_s1 + $0x24] ss:$8 sps:$4 sm:$0xff]   ;;  %v1194_v6 = vld [vmem:[%s1665_s1 + $0x20] ss:$8 sps:$4 sm:$0xff]  }
   0x3   :  { %153 = vmatpush1.bf16.msra.mxu0 %v1188_v2  ;;  %v1195_v7 = vld [vmem:[%s1665_s1 + $0x34] ss:$8 sps:$4 sm:$0xff]   ;;  %v1357_v8 = vld [vmem:[%s1666_s3 + $0x4] ss:$8 sps:$4 sm:$0xff]   ;;  %v1362_v9 = vld [vmem:[%s1666_s3] ss:$8 sps:$4 sm:$0xff]  }
   0x4   :  { %154 = vmatprep.subr.bf16.mxu0 %v1189_v3  ;;  %v1197_v10 = vld [vmem:[%s1665_s1 + $0x30] ss:$8 sps:$4 sm:$0xff]   ;;  %350 = vmatprep.subr.bf16.mxu1 %v1357_v8  ;;  %v1198_v11 = vld [vmem:[%s1665_s1 + $0x44] ss:$8 sps:$4 sm:$0xff]   ;;  %v1374_v12 = vld [vmem:[%s1666_s3 + $0x14] ss:$8 sps:$4 sm:$0xff]  }
   0x5   :  { %351 = vmatpush1.bf16.msra.mxu1 %v1362_v9  ;;  %v1200_v13 = vld [vmem:[%s1665_s1 + $0x40] ss:$8 sps:$4 sm:$0xff]   ;;  %v1383_v14 = vld [vmem:[%s1666_s3 + $0x10] ss:$8 sps:$4 sm:$0xff]   ;;  %v1389_v15 = vld [vmem:[%s1666_s3 + $0x24] ss:$8 sps:$4 sm:$0xff]  }
   0x6   :  { %352 = vmatprep.subr.bf16.mxu1 %v1374_v12  ;;  %v1201_v16 = vld [vmem:[%s1665_s1 + $0x54] ss:$8 sps:$4 sm:$0xff]   ;;  %v1399_v17 = vld [vmem:[%s1666_s3 + $0x20] ss:$8 sps:$4 sm:$0xff]   ;;  %v1203_v18 = vld [vmem:[%s1665_s1 + $0x50] ss:$8 sps:$4 sm:$0xff]  }
   0x7   :  { %155 = vmatpush1.bf16.msra.mxu0 %v1191_v4  ;;  %v1407_v19 = vld [vmem:[%s1666_s3 + $0x34] ss:$8 sps:$4 sm:$0xff]   ;;  %v1204_v20 = vld [vmem:[%s1667_s0] sm:$0xff]   ;;  %v1417_v21 = vld [vmem:[%s1666_s3 + $0x30] ss:$8 sps:$4 sm:$0xff]   ;;  %v50_v26 = vshrl.u32 %v49_v25, 7 }
   0x8   :  { %156 = vmatprep.subr.bf16.mxu0 %v1192_v5  ;;  %v1208_v22 = vld [vmem:[%s1667_s0 + $0x8] sm:$0xff]   ;;  %v1212_v23 = vld [vmem:[%s1667_s0 + $0x10] sm:$0xff]   ;;  %v1216_v24 = vld [vmem:[%s1667_s0 + $0x18] sm:$0xff]   ;;  %vm897_vm2 = vcmask 261120  }
   0x9   :  { %353 = vmatpush1.bf16.msra.mxu1 %v1383_v14  ;;  %v51_v27 = vsub.s32 0, %v50_v26  ;;  %v47_v28 = vld [vmem:[%s1668_s2] sm:$0x3]  ;;  %v55_v29 = vsub.s32 1, %v50_v26  ;;  %s1289_s2 = smov 64  }
   0xa   :  { %354 = vmatprep.subr.bf16.mxu1 %v1389_v15 }
   0xb   :  { %157 = vmatpush1.bf16.msra.mxu0 %v1194_v6  ;;  %v52_v31 = vrot.slane %v47_v28, %v51_v27  ;;  %v56_v33 = vrot.slane %v47_v28, %v55_v29 }
   0xc   :  { %158 = vmatprep.subr.bf16.mxu0 %v1195_v7 }
   0xd   :  { %355 = vmatpush1.bf16.msra.mxu1 %v1399_v17 }
   0xe   :  { %356 = vmatprep.subr.bf16.mxu1 %v1407_v19 }
   0xf   :  { %159 = vmatpush1.bf16.msra.mxu0 %v1197_v10 }
  0x10   :  { %160 = vmatprep.subr.bf16.mxu0 %v1198_v11 }
  0x11   :  { %357 = vmatpush1.bf16.msra.mxu1 %v1417_v21 }
  0x12   :  { %423 = vmatprep.subr.bf16.mxu1 %v1357_v8 }
  0x13   :  { %161 = vmatpush1.bf16.msra.mxu0 %v1200_v13 }
  0x14   :  { %162 = vmatprep.subr.bf16.mxu0 %v1201_v16 }
  0x17   :  { %163 = vmatpush1.bf16.msra.mxu0 %v1203_v18 }
  0x18   :  { %277 = vmatprep.subr.bf16.mxu0 %v1357_v8 }
  0x1a   :  { %1107 = vmatmul.mubr.msk.bf16.vlgmr.msra.gmra.mrb[0].mxu0 %vm139_vm0, %v1204_v20 }
  0x1b   :  { %278 = vmatpush1.bf16.msra.mxu0 %v1362_v9  ;;  %194 = vmatprep.mubr.bf16.mxu0 %v1288_v1 }
  0x1c   :  { %279 = vmatprep.subr.bf16.mxu0 %v1374_v12 }
  0x1f   :  { %280 = vmatpush1.bf16.msra.mxu0 %v1383_v14 }
  0x20   :  { %281 = vmatprep.subr.bf16.mxu0 %v1389_v15 }
  0x22   :  { %1108 = vmatmul.mubr.msk.bf16.gmra.mrb[4].mxu0 %vm139_vm0, %v1208_v22 }
  0x23   :  { %204 = vmatprep.mubr.bf16.mxu0 %v1288_v1  ;;  %282 = vmatpush1.bf16.msra.mxu0 %v1399_v17 }
  0x24   :  { %283 = vmatprep.subr.bf16.mxu0 %v1407_v19 }
  0x27   :  { %284 = vmatpush1.bf16.msra.mxu0 %v1417_v21 }
  0x28   :  { %496 = vmatprep.subr.bf16.mxu0 %v1357_v8 }
  0x2a   :  { %1109 = vmatmul.mubr.msk.bf16.gmra.mrb[8].mxu0 %vm139_vm0, %v1212_v23 }
  0x2b   :  { %214 = vmatprep.mubr.bf16.mxu0 %v1288_v1 }
  0x32   :  { %1110 = vmatmul.mubr.msk.bf16.gmra.mrb[12].mxu0 %vm139_vm0, %v1216_v24 }
  0x33   :  { %309 = vmatprep.mubr.bf16.mxu0 %v1288_v1 }
  0x3a   :  { %310 = vmatmul.mubr.bf16.vlgmr.msra.gmra.mrb[16].mxu0 %v1288_v1 }
  0x3b   :  { %497 = vmatpush1.bf16.msra.mxu0 %v1362_v9  ;;  %528 = vmatprep.mubr.bf16.mxu0 %v1288_v1 }
  0x3c   :  { %498 = vmatprep.subr.bf16.mxu0 %v1374_v12 }
  0x3f   :  { %499 = vmatpush1.bf16.msra.mxu0 %v1383_v14 }
  0x40   :  { %500 = vmatprep.subr.bf16.mxu0 %v1389_v15 }
  0x43   :  { %501 = vmatpush1.bf16.msra.mxu0 %v1399_v17 }
  0x44   :  { %502 = vmatprep.subr.bf16.mxu0 %v1407_v19 }
  0x47   :  { %503 = vmatpush1.bf16.msra.mxu0 %v1417_v21 }
  0x48   :  { %642 = vmatprep.subr.bf16.mxu0 %v1357_v8 }
  0xed   :  { %v186_v30 = vpop.f32.mrb[0].mxu0 }
  0xee   :  { %v188_v32 = vpop.f32.mrb[1].mxu0  ;;  %v187_v62 = vadd.f32 %v186_v30, %v52_v31 }
  0xef   :  { %v190_v34 = vpop.f32.mrb[2].mxu0  ;;  %v189_v63 = vadd.f32 %v188_v32, %v56_v33 }
  0xf0   :  { %v1460_v35 = vadd.f32 %v190_v34, %v52_v31  ;;  %v192_v36 = vpop.f32.mrb[3].mxu0 }
  0xf1   :  { %v1462_v37 = vadd.f32 %v192_v36, %v56_v33 }
  0xf5   :  { %v196_v38 = vpop.f32.mrb[4].mxu0 }
  0xf6   :  { %v1464_v39 = vadd.f32 %v196_v38, %v52_v31  ;;  %v198_v40 = vpop.f32.mrb[5].mxu0 }
  0xf7   :  { %v1466_v41 = vadd.f32 %v198_v40, %v56_v33  ;;  %v200_v42 = vpop.f32.mrb[6].mxu0 }
  0xf8   :  { %v1468_v43 = vadd.f32 %v200_v42, %v52_v31  ;;  %v202_v44 = vpop.f32.mrb[7].mxu0 }
  0xf9   :  { %v1470_v45 = vadd.f32 %v202_v44, %v56_v33 }
  0xfd   :  { %v206_v46 = vpop.f32.mrb[8].mxu0 }
  0xfe   :  { %v1472_v47 = vadd.f32 %v206_v46, %v52_v31  ;;  %v208_v48 = vpop.f32.mrb[9].mxu0 }
  0xff   :  { %v1474_v49 = vadd.f32 %v208_v48, %v56_v33  ;;  %v210_v50 = vpop.f32.mrb[10].mxu0 }
 0x100   :  { %v1476_v51 = vadd.f32 %v210_v50, %v52_v31  ;;  %v212_v52 = vpop.f32.mrb[11].mxu0 }
 0x101   :  { %v1478_v53 = vadd.f32 %v212_v52, %v56_v33 }
 0x105   :  { %v216_v54 = vpop.f32.mrb[12].mxu0 }
 0x106   :  { %v1480_v55 = vadd.f32 %v216_v54, %v52_v31  ;;  %v218_v56 = vpop.f32.mrb[13].mxu0 }
 0x107   :  { %v1482_v57 = vadd.f32 %v218_v56, %v56_v33  ;;  %v220_v58 = vpop.f32.mrb[14].mxu0 }
 0x108   :  { %v1484_v59 = vadd.f32 %v220_v58, %v52_v31  ;;  %v222_v60 = vpop.f32.mrb[15].mxu0 }
 0x109   :  { %v1486_v61 = vadd.f32 %v222_v60, %v56_v33 }
 0x10d   :  { %v311_v0 = vpop.f32.mrb[16].mxu0 }
 0x10e   :  { %v318_v2 = vadd.f32 %v311_v0, %v187_v62  ;;  %v313_v3 = vpop.f32.mrb[17].mxu0 }
 0x10f   :  { %v319_v4 = vadd.f32 %v313_v3, %v189_v63  ;;  %v315_v5 = vpop.f32.mrb[18].mxu0 }
 0x110   :  { %v316_v6 = vpop.f32.mrb[19].mxu0  ;;  %v320_v10 = vmul.f32 0.5, %v318_v2 }
 0x111   :  { %1224 = vtanh.f32 %v319_v4  ;;  %v321_v26 = vmul.f32 0.5, %v319_v4 }
 0x112   :  { %1226 = vtanh.f32 %v320_v10 }
 0x11b   :  { %v1225_v7 = vpop.eup %1224 }
 0x11c   :  { %331 = vrot.lane.b32.xlu0 %v1225_v7, %s1289_s2  ;;  %v1227_v11 = vpop.eup %1226 }
 0x11d   :  { %v324_v13 = vmul.f32 0.5, %v1227_v11 }
 0x11f   :  { %v326_v16 = vadd.f32 0.5, %v324_v13 }
 0x121   :  { %v329_v22 = vmul.f32 0.0, %v326_v16 }
 0x18e   :  { %v332_v18 = vpop.permute.xlu0 %331 }
 0x18f   :  { %v334_v20 = vmul.f32 %v332_v18, %v326_v16 }
 0x191   :  { %336 = vrot.lane.b32.xlu0 %v334_v20, %s1289_s2 }
 0x203   :  { %v337_v23 = vpop.permute.xlu0 %336 }
 0x204   :  { %v339_v24 = vadd.f32 %v337_v23, %v329_v22 }
 0x206   :  { %1228 = vtanh.f32 %v339_v24 }
 0x207   :  { %1230 = vtanh.f32 %v321_v26 }
 0x210   :  { %v1229_v25 = vpop.eup %1228 }
 0x211   :  { %342 = vrot.lane.b32.xlu1 %v1229_v25, %s1289_s2  ;;  %v1231_v27 = vpop.eup %1230 }
 0x212   :  { %v325_v28 = vmul.f32 0.5, %v1231_v27 }
 0x214   :  { %v327_v29 = vadd.f32 0.5, %v325_v28 }
 0x283   :  { %v343_v30 = vpop.permute.xlu1 %342 }
 0x284   :  { %v1491_v31 = vmul.f32 %v343_v30, %v327_v29 }
 0x286   :  { %v346_v32 = vpack.c.bf16 %v1491_v31, %v1491_v31 }
 0x288   :  { %1119 = vmatmul.mubr.msk.bf16.vlgmr.msra.gmra.mrb[0].mxu1 %vm273_vm1, %v346_v32 }
 0x289   :  { %424 = vmatpush1.bf16.msra.mxu1 %v1362_v9  ;;  %455 = vmatprep.mubr.bf16.mxu1 %v1288_v1 }
 0x28a   :  { %425 = vmatprep.subr.bf16.mxu1 %v1374_v12 }
 0x28d   :  { %426 = vmatpush1.bf16.msra.mxu1 %v1383_v14 }
 0x28e   :  { %427 = vmatprep.subr.bf16.mxu1 %v1389_v15 }
 0x291   :  { %428 = vmatpush1.bf16.msra.mxu1 %v1399_v17 }
 0x292   :  { %429 = vmatprep.subr.bf16.mxu1 %v1407_v19 }
 0x295   :  { %430 = vmatpush1.bf16.msra.mxu1 %v1417_v21 }
 0x296   :  { %569 = vmatprep.subr.bf16.mxu1 %v1357_v8 }
 0x35b   :  { %v384_v33 = vpop.f32.mrb[0].mxu1 }
 0x35c   :  { %v391_v34 = vadd.f32 %v384_v33, %v1460_v35  ;;  %v386_v36 = vpop.f32.mrb[1].mxu1 }
 0x35d   :  { %v392_v38 = vadd.f32 %v386_v36, %v1462_v37  ;;  %v388_v40 = vpop.f32.mrb[2].mxu1 }
 0x35e   :  { %v389_v42 = vpop.f32.mrb[3].mxu1  ;;  %v393_v46 = vmul.f32 0.5, %v391_v34 }
 0x35f   :  { %1232 = vtanh.f32 %v392_v38  ;;  %v394_v62 = vmul.f32 0.5, %v392_v38 }
 0x360   :  { %1234 = vtanh.f32 %v393_v46 }
 0x369   :  { %v1233_v44 = vpop.eup %1232 }
 0x36a   :  { %404 = vrot.lane.b32.xlu1 %v1233_v44, %s1289_s2  ;;  %v1235_v48 = vpop.eup %1234 }
 0x36b   :  { %v397_v50 = vmul.f32 0.5, %v1235_v48 }
 0x36d   :  { %v399_v52 = vadd.f32 0.5, %v397_v50 }
 0x36f   :  { %v402_v58 = vmul.f32 %v399_v52, %v339_v24 }
 0x3dc   :  { %v405_v54 = vpop.permute.xlu1 %404 }
 0x3dd   :  { %v407_v56 = vmul.f32 %v405_v54, %v399_v52 }
 0x3df   :  { %409 = vrot.lane.b32.xlu0 %v407_v56, %s1289_s2 }
 0x451   :  { %v410_v35 = vpop.permute.xlu0 %409 }
 0x452   :  { %v412_v60 = vadd.f32 %v410_v35, %v402_v58 }
 0x454   :  { %1236 = vtanh.f32 %v412_v60 }
 0x455   :  { %1238 = vtanh.f32 %v394_v62 }
 0x45e   :  { %v1237_v37 = vpop.eup %1236 }
 0x45f   :  { %415 = vrot.lane.b32.xlu1 %v1237_v37, %s1289_s2  ;;  %v1239_v63 = vpop.eup %1238 }
 0x460   :  { %v398_v0 = vmul.f32 0.5, %v1239_v63 }
 0x462   :  { %v400_v2 = vadd.f32 0.5, %v398_v0 }
 0x4d1   :  { %v416_v3 = vpop.permute.xlu1 %415 }
 0x4d2   :  { %v1510_v4 = vmul.f32 %v416_v3, %v400_v2 }
 0x4d4   :  { %v419_v5 = vpack.c.bf16 %v1510_v4, %v1510_v4 }
 0x4d6   :  { %1120 = vmatmul.mubr.msk.bf16.vlgmr.msra.gmra.mrb[4].mxu1 %vm273_vm1, %v419_v5 }
 0x4d7   :  { %570 = vmatpush1.bf16.msra.mxu1 %v1362_v9  ;;  %601 = vmatprep.mubr.bf16.mxu1 %v1288_v1 }
 0x4d8   :  { %571 = vmatprep.subr.bf16.mxu1 %v1374_v12 }
 0x4db   :  { %572 = vmatpush1.bf16.msra.mxu1 %v1383_v14 }
 0x4dc   :  { %573 = vmatprep.subr.bf16.mxu1 %v1389_v15 }
 0x4df   :  { %574 = vmatpush1.bf16.msra.mxu1 %v1399_v17 }
 0x4e0   :  { %575 = vmatprep.subr.bf16.mxu1 %v1407_v19 }
 0x4e3   :  { %576 = vmatpush1.bf16.msra.mxu1 %v1417_v21 }
 0x4e4   :  { %715 = vmatprep.subr.bf16.mxu1 %v1357_v8 }
 0x5a9   :  { %v457_v6 = vpop.f32.mrb[4].mxu1 }
 0x5aa   :  { %v464_v7 = vadd.f32 %v457_v6, %v1464_v39  ;;  %v459_v10 = vpop.f32.mrb[5].mxu1 }
 0x5ab   :  { %v465_v11 = vadd.f32 %v459_v10, %v1466_v41  ;;  %v461_v13 = vpop.f32.mrb[6].mxu1 }
 0x5ac   :  { %v462_v16 = vpop.f32.mrb[7].mxu1  ;;  %v466_v20 = vmul.f32 0.5, %v464_v7 }
 0x5ad   :  { %1240 = vtanh.f32 %v465_v11  ;;  %v467_v29 = vmul.f32 0.5, %v465_v11 }
 0x5ae   :  { %1242 = vtanh.f32 %v466_v20 }
 0x5b7   :  { %v1241_v18 = vpop.eup %1240 }
 0x5b8   :  { %477 = vrot.lane.b32.xlu0 %v1241_v18, %s1289_s2  ;;  %v1243_v22 = vpop.eup %1242 }
 0x5b9   :  { %v470_v23 = vmul.f32 0.5, %v1243_v22 }
 0x5bb   :  { %v472_v24 = vadd.f32 0.5, %v470_v23 }
 0x5bd   :  { %v475_v27 = vmul.f32 %v472_v24, %v412_v60 }
 0x62a   :  { %v478_v25 = vpop.permute.xlu0 %477 }
 0x62b   :  { %v480_v26 = vmul.f32 %v478_v25, %v472_v24 }
 0x62d   :  { %482 = vrot.lane.b32.xlu1 %v480_v26, %s1289_s2 }
 0x69f   :  { %v483_v39 = vpop.permute.xlu1 %482 }
 0x6a0   :  { %v485_v28 = vadd.f32 %v483_v39, %v475_v27 }
 0x6a2   :  { %1244 = vtanh.f32 %v485_v28 }
 0x6a3   :  { %1246 = vtanh.f32 %v467_v29 }
 0x6ac   :  { %v1245_v41 = vpop.eup %1244 }
 0x6ad   :  { %488 = vrot.lane.b32.xlu0 %v1245_v41, %s1289_s2  ;;  %v1247_v30 = vpop.eup %1246 }
 0x6ae   :  { %v471_v32 = vmul.f32 0.5, %v1247_v30 }
 0x6b0   :  { %v473_v33 = vadd.f32 0.5, %v471_v32 }
 0x71f   :  { %v489_v34 = vpop.permute.xlu0 %488 }
 0x720   :  { %v1529_v36 = vmul.f32 %v489_v34, %v473_v33 }
 0x722   :  { %v492_v38 = vpack.c.bf16 %v1529_v36, %v1529_v36 }
 0x724   :  { %1121 = vmatmul.mubr.msk.bf16.vlgmr.msra.gmra.mrb[20].mxu0 %vm273_vm1, %v492_v38 }
 0x725   :  { %643 = vmatpush1.bf16.msra.mxu0 %v1362_v9  ;;  %674 = vmatprep.mubr.bf16.mxu0 %v1288_v1 }
 0x726   :  { %644 = vmatprep.subr.bf16.mxu0 %v1374_v12 }
 0x729   :  { %645 = vmatpush1.bf16.msra.mxu0 %v1383_v14 }
 0x72a   :  { %646 = vmatprep.subr.bf16.mxu0 %v1389_v15 }
 0x72d   :  { %647 = vmatpush1.bf16.msra.mxu0 %v1399_v17 }
 0x72e   :  { %648 = vmatprep.subr.bf16.mxu0 %v1407_v19 }
 0x731   :  { %649 = vmatpush1.bf16.msra.mxu0 %v1417_v21 }
 0x732   :  { %788 = vmatprep.subr.bf16.mxu0 %v1357_v8 }
 0x7f7   :  { %v530_v40 = vpop.f32.mrb[20].mxu0 }
 0x7f8   :  { %v537_v42 = vadd.f32 %v530_v40, %v1468_v43  ;;  %v532_v44 = vpop.f32.mrb[21].mxu0 }
 0x7f9   :  { %v538_v46 = vadd.f32 %v532_v44, %v1470_v45  ;;  %v534_v48 = vpop.f32.mrb[22].mxu0 }
 0x7fa   :  { %v535_v50 = vpop.f32.mrb[23].mxu0  ;;  %v539_v54 = vmul.f32 0.5, %v537_v42 }
 0x7fb   :  { %1248 = vtanh.f32 %v538_v46  ;;  %v540_v63 = vmul.f32 0.5, %v538_v46 }
 0x7fc   :  { %1250 = vtanh.f32 %v539_v54 }
 0x805   :  { %v1249_v52 = vpop.eup %1248 }
 0x806   :  { %550 = vrot.lane.b32.xlu1 %v1249_v52, %s1289_s2  ;;  %v1251_v56 = vpop.eup %1250 }
 0x807   :  { %v543_v58 = vmul.f32 0.5, %v1251_v56 }
 0x809   :  { %v545_v35 = vadd.f32 0.5, %v543_v58 }
 0x80b   :  { %v548_v8 = vmul.f32 %v545_v35, %v485_v28 }
 0x878   :  { %v551_v60 = vpop.permute.xlu1 %550 }
 0x879   :  { %v553_v37 = vmul.f32 %v551_v60, %v545_v35 }
 0x87b   :  { %555 = vrot.lane.b32.xlu0 %v553_v37, %s1289_s2 }
 0x8ed   :  { %v556_v43 = vpop.permute.xlu0 %555 }
 0x8ee   :  { %v558_v62 = vadd.f32 %v556_v43, %v548_v8 }
 0x8f0   :  { %1252 = vtanh.f32 %v558_v62 }
 0x8f1   :  { %1254 = vtanh.f32 %v540_v63 }
 0x8fa   :  { %v1253_v45 = vpop.eup %1252 }
 0x8fb   :  { %561 = vrot.lane.b32.xlu1 %v1253_v45, %s1289_s2  ;;  %v1255_v0 = vpop.eup %1254 }
 0x8fc   :  { %v544_v2 = vmul.f32 0.5, %v1255_v0 }
 0x8fe   :  { %v546_v3 = vadd.f32 0.5, %v544_v2 }
 0x96d   :  { %v562_v5 = vpop.permute.xlu1 %561 }
 0x96e   :  { %v1548_v6 = vmul.f32 %v562_v5, %v546_v3 }
 0x970   :  { %v565_v7 = vpack.c.bf16 %v1548_v6, %v1548_v6 }
 0x972   :  { %1122 = vmatmul.mubr.msk.bf16.vlgmr.msra.gmra.mrb[8].mxu1 %vm273_vm1, %v565_v7 }
 0x973   :  { %716 = vmatpush1.bf16.msra.mxu1 %v1362_v9  ;;  %747 = vmatprep.mubr.bf16.mxu1 %v1288_v1 }
 0x974   :  { %717 = vmatprep.subr.bf16.mxu1 %v1374_v12 }
 0x977   :  { %718 = vmatpush1.bf16.msra.mxu1 %v1383_v14 }
 0x978   :  { %719 = vmatprep.subr.bf16.mxu1 %v1389_v15 }
 0x97b   :  { %720 = vmatpush1.bf16.msra.mxu1 %v1399_v17 }
 0x97c   :  { %721 = vmatprep.subr.bf16.mxu1 %v1407_v19 }
 0x97f   :  { %722 = vmatpush1.bf16.msra.mxu1 %v1417_v21 }
 0xa45   :  { %v603_v10 = vpop.f32.mrb[8].mxu1 }
 0xa46   :  { %v610_v11 = vadd.f32 %v603_v10, %v1472_v47  ;;  %v605_v13 = vpop.f32.mrb[9].mxu1 }
 0xa47   :  { %v611_v16 = vadd.f32 %v605_v13, %v1474_v49  ;;  %v607_v18 = vpop.f32.mrb[10].mxu1 }
 0xa48   :  { %v608_v20 = vpop.f32.mrb[11].mxu1  ;;  %v612_v23 = vmul.f32 0.5, %v610_v11 }
 0xa49   :  { %1256 = vtanh.f32 %v611_v16  ;;  %v613_v29 = vmul.f32 0.5, %v611_v16 }
 0xa4a   :  { %1258 = vtanh.f32 %v612_v23 }
 0xa53   :  { %v1257_v22 = vpop.eup %1256 }
 0xa54   :  { %623 = vrot.lane.b32.xlu0 %v1257_v22, %s1289_s2  ;;  %v1259_v24 = vpop.eup %1258 }
 0xa55   :  { %v616_v25 = vmul.f32 0.5, %v1259_v24 }
 0xa57   :  { %v618_v26 = vadd.f32 0.5, %v616_v25 }
 0xa59   :  { %v621_v28 = vmul.f32 %v618_v26, %v558_v62 }
 0xac6   :  { %v624_v27 = vpop.permute.xlu0 %623 }
 0xac7   :  { %v626_v39 = vmul.f32 %v624_v27, %v618_v26 }
 0xac9   :  { %628 = vrot.lane.b32.xlu1 %v626_v39, %s1289_s2 }
 0xb3b   :  { %v629_v47 = vpop.permute.xlu1 %628 }
 0xb3c   :  { %v631_v41 = vadd.f32 %v629_v47, %v621_v28 }
 0xb3e   :  { %1260 = vtanh.f32 %v631_v41 }
 0xb3f   :  { %1262 = vtanh.f32 %v613_v29 }
 0xb48   :  { %v1261_v49 = vpop.eup %1260 }
 0xb49   :  { %634 = vrot.lane.b32.xlu0 %v1261_v49, %s1289_s2  ;;  %v1263_v30 = vpop.eup %1262 }
 0xb4a   :  { %v617_v32 = vmul.f32 0.5, %v1263_v30 }
 0xb4c   :  { %v619_v33 = vadd.f32 0.5, %v617_v32 }
 0xbbb   :  { %v635_v34 = vpop.permute.xlu0 %634 }
 0xbbc   :  { %v1566_v38 = vmul.f32 %v635_v34, %v619_v33 }
 0xbbe   :  { %v638_v40 = vpack.c.bf16 %v1566_v38, %v1566_v38 }
 0xbc0   :  { %1123 = vmatmul.mubr.msk.bf16.vlgmr.msra.gmra.mrb[24].mxu0 %vm273_vm1, %v638_v40 }
 0xbc1   :  { %789 = vmatpush1.bf16.msra.mxu0 %v1362_v9  ;;  %820 = vmatprep.mubr.bf16.mxu0 %v1288_v1 }
 0xbc2   :  { %790 = vmatprep.subr.bf16.mxu0 %v1374_v12 }
 0xbc5   :  { %791 = vmatpush1.bf16.msra.mxu0 %v1383_v14 }
 0xbc6   :  { %792 = vmatprep.subr.bf16.mxu0 %v1389_v15 }
 0xbc9   :  { %793 = vmatpush1.bf16.msra.mxu0 %v1399_v17 }
 0xbca   :  { %794 = vmatprep.subr.bf16.mxu0 %v1407_v19 }
 0xbcd   :  { %795 = vmatpush1.bf16.msra.mxu0 %v1417_v21 }
 0xc93   :  { %v676_v42 = vpop.f32.mrb[24].mxu0 }
 0xc94   :  { %v683_v44 = vadd.f32 %v676_v42, %v1476_v51  ;;  %v678_v46 = vpop.f32.mrb[25].mxu0 }
 0xc95   :  { %v684_v9 = vadd.f32 %v678_v46, %v1478_v53  ;;  %v680_v48 = vpop.f32.mrb[26].mxu0 }
 0xc96   :  { %v681_v1 = vpop.f32.mrb[27].mxu0  ;;  %v685_v14 = vmul.f32 0.5, %v683_v44 }
 0xc97   :  { %1264 = vtanh.f32 %v684_v9  ;;  %v686_v56 = vmul.f32 0.5, %v684_v9 }
 0xc98   :  { %1266 = vtanh.f32 %v685_v14 }
 0xca1   :  { %v1265_v12 = vpop.eup %1264 }
 0xca2   :  { %696 = vrot.lane.b32.xlu1 %v1265_v12, %s1289_s2  ;;  %v1267_v15 = vpop.eup %1266  ;;  %v1221_v12 = vld [vmem:[%s1669_s5 + $0x8] sm:$0xff]  }
 0xca3   :  { %v689_v17 = vmul.f32 0.5, %v1267_v15 }
 0xca5   :  { %v691_v50 = vadd.f32 0.5, %v689_v17  ;;  %v864_v17 = vpack.c.bf16 %v1491_v31, %v1510_v4 }
 0xca7   :  { %v694_v21 = vmul.f32 %v691_v50, %v631_v41 }
 0xd14   :  { %v697_v19 = vpop.permute.xlu1 %696 }
 0xd15   :  { %v699_v52 = vmul.f32 %v697_v19, %v691_v50 }
 0xd17   :  { %701 = vrot.lane.b32.xlu0 %v699_v52, %s1289_s2  ;;  %v1222_v52 = vld [vmem:[%s1670_s4] sm:$0xff]  }
 0xd89   :  { %v702_v51 = vpop.permute.xlu0 %701 }
 0xd8a   :  { %v704_v54 = vadd.f32 %v702_v51, %v694_v21 }
 0xd8c   :  { %1268 = vtanh.f32 %v704_v54 }
 0xd8d   :  { %1270 = vtanh.f32 %v686_v56 }
 0xd96   :  { %v1269_v53 = vpop.eup %1268 }
 0xd97   :  { %707 = vrot.lane.b32.xlu1 %v1269_v53, %s1289_s2  ;;  %v1271_v58 = vpop.eup %1270 }
 0xd98   :  { %v690_v35 = vmul.f32 0.5, %v1271_v58  ;;  %v863_v58 = vpack.c.bf16 %v1529_v36, %v1548_v6 }
 0xd9a   :  { %v692_v60 = vadd.f32 0.5, %v690_v35 }
 0xe09   :  { %v708_v37 = vpop.permute.xlu1 %707 }
 0xe0a   :  { %v1584_v8 = vmul.f32 %v708_v37, %v692_v60  ;;  %v1223_v60 = vld [vmem:[%s1670_s4 + $0x8] sm:$0xff]  }
 0xe0c   :  { %v711_v43 = vpack.c.bf16 %v1584_v8, %v1584_v8  ;;  %v862_v15 = vpack.c.bf16 %v1566_v38, %v1584_v8 }
 0xe0e   :  { %1124 = vmatmul.mubr.msk.bf16.vlgmr.msra.gmra.mrb[12].mxu1 %vm273_vm1, %v711_v43 }
 0xee1   :  { %v749_v62 = vpop.f32.mrb[12].mxu1 }
 0xee2   :  { %v756_v45 = vadd.f32 %v749_v62, %v1480_v55  ;;  %v751_v63 = vpop.f32.mrb[13].mxu1  ;;  %v857_v62 = vpack.c.bf16 %v1510_v4, %v1491_v31  ;;  %v1138_v31 = vld [vmem:[%s1671_s6] ss:$0 sm:$0xff] }
 0xee3   :  { %v757_v0 = vadd.f32 %v751_v63, %v1482_v57  ;;  %v753_v2 = vpop.f32.mrb[14].mxu1  ;;  %v858_v63 = vpack.c.bf16 %v1548_v6, %v1529_v36 }
 0xee4   :  { %v754_v3 = vpop.f32.mrb[15].mxu1  ;;  %v758_v7 = vmul.f32 0.5, %v756_v45 }
 0xee5   :  { %1272 = vtanh.f32 %v757_v0  ;;  %v759_v23 = vmul.f32 0.5, %v757_v0  ;;  %v859_v0 = vpack.c.bf16 %v1584_v8, %v1566_v38 }
 0xee6   :  { %1274 = vtanh.f32 %v758_v7 }
 0xeef   :  { %v1273_v5 = vpop.eup %1272 }
 0xef0   :  { %769 = vrot.lane.b32.xlu0 %v1273_v5, %s1289_s2  ;;  %v1275_v10 = vpop.eup %1274 }
 0xef1   :  { %v762_v11 = vmul.f32 0.5, %v1275_v10 }
 0xef3   :  { %v764_v13 = vadd.f32 0.5, %v762_v11 }
 0xef5   :  { %v767_v20 = vmul.f32 %v764_v13, %v704_v54 }
 0xf62   :  { %v770_v16 = vpop.permute.xlu0 %769 }
 0xf63   :  { %v772_v18 = vmul.f32 %v770_v16, %v764_v13 }
 0xf65   :  { %774 = vrot.lane.b32.xlu1 %v772_v18, %s1289_s2 }
 0xfd7   :  { %v775_v55 = vpop.permute.xlu1 %774 }
 0xfd8   :  { %v777_v22 = vadd.f32 %v775_v55, %v767_v20 }
 0xfda   :  { %1276 = vtanh.f32 %v777_v22 }
 0xfdb   :  { %1278 = vtanh.f32 %v759_v23 }
 0xfe4   :  { %v1277_v57 = vpop.eup %1276 }
 0xfe5   :  { %780 = vrot.lane.b32.xlu0 %v1277_v57, %s1289_s2  ;;  %v1279_v24 = vpop.eup %1278 }
 0xfe6   :  { %v763_v25 = vmul.f32 0.5, %v1279_v24 }
 0xfe8   :  { %v765_v26 = vadd.f32 0.5, %v763_v25 }
0x1057   :  { %v781_v27 = vpop.permute.xlu0 %780 }
0x1058   :  { %v1594_v39 = vmul.f32 %v781_v27, %v765_v26 }
0x105a   :  { %v784_v28 = vpack.c.bf16 %v1594_v39, %v1594_v39 }
0x105c   :  { %1125 = vmatmul.mubr.msk.bf16.vlgmr.msra.gmra.mrb[28].mxu0 %vm273_vm1, %v784_v28 }
0x112f   :  { %v822_v47 = vpop.f32.mrb[28].mxu0 }
0x1130   :  { %v829_v41 = vadd.f32 %v822_v47, %v1484_v59  ;;  %v824_v49 = vpop.f32.mrb[29].mxu0 }
0x1131   :  { %v830_v29 = vadd.f32 %v824_v49, %v1486_v61  ;;  %v826_v30 = vpop.f32.mrb[30].mxu0  ;;  %v1220_v61 = vld [vmem:[%s1669_s5] sm:$0xff]  }
0x1132   :  { %v827_v32 = vpop.f32.mrb[31].mxu0  ;;  %v831_v34 = vmul.f32 0.5, %v829_v41  ;;  %1151 = vmatprep.subr.bf16.mxu1 %v1220_v61 }
0x1133   :  { %1280 = vtanh.f32 %v830_v29  ;;  %1152 = vmatpush3.bf16.msra.mxu1 %v1220_v61  ;;  %v832_v50 = vmul.f32 0.5, %v830_v29 }
0x1134   :  { %1282 = vtanh.f32 %v831_v34  ;;  %1153 = vmatprep.subr.bf16.mxu1 %v1221_v12 }
0x1137   :  { %1154 = vmatpush3.bf16.msra.mxu1 %v1221_v12 }
0x1138   :  { %1163 = vmatprep.subr.bf16.mxu1 %v1222_v52 }
0x113d   :  { %v1281_v33 = vpop.eup %1280 }
0x113e   :  { %842 = vrot.lane.b32.xlu1 %v1281_v33, %s1289_s2  ;;  %v1283_v40 = vpop.eup %1282 }
0x113f   :  { %v835_v42 = vmul.f32 0.5, %v1283_v40 }
0x1141   :  { %v837_v44 = vadd.f32 0.5, %v835_v42 }
0x1143   :  { %v840_v48 = vmul.f32 %v837_v44, %v777_v22 }
0x11b0   :  { %v843_v46 = vpop.permute.xlu1 %842 }
0x11b1   :  { %v845_v9 = vmul.f32 %v843_v46, %v837_v44 }
0x11b3   :  { %847 = vrot.lane.b32.xlu0 %v845_v9, %s1289_s2 }
0x1225   :  { %v848_v59 = vpop.permute.xlu0 %847 }
0x1226   :  { %v850_v1 = vadd.f32 %v848_v59, %v840_v48 }
0x1228   :  { %1284 = vtanh.f32 %v850_v1 }
0x1229   :  { %1286 = vtanh.f32 %v832_v50 }
0x1232   :  { %v1285_v14 = vpop.eup %1284 }
0x1233   :  { %853 = vrot.lane.b32.xlu1 %v1285_v14, %s1289_s2  ;;  %v1287_v19 = vpop.eup %1286 }
0x1234   :  { %v836_v21 = vmul.f32 0.5, %v1287_v19 }
0x1236   :  { %v838_v51 = vadd.f32 0.5, %v836_v21 }
0x1237   :  { %879 = vrot.lane.b32.xlu1 %v862_v15, %s1290_s29 }
0x123b   :  { %883 = vrot.lane.b32.xlu1 %v864_v17, %s1290_s29 }
0x12a5   :  { %v854_v54 = vpop.permute.xlu1 %853 }
0x12a6   :  { %v856_v53 = vmul.f32 %v854_v54, %v838_v51 }
0x12a8   :  { %v861_v56 = vpack.c.bf16 %v1594_v39, %v856_v53  ;;  %v860_v2 = vpack.c.bf16 %v856_v53, %v1594_v39 }
0x12a9   :  { %v880_v37 = vpop.permute.xlu1 %879 }
0x12aa   :  { %877 = vrot.lane.b32.xlu0 %v861_v56, %s1290_s29 }
0x12ad   :  { %v884_v45 = vpop.permute.xlu1 %883 }
0x12ae   :  { %881 = vrot.lane.b32.xlu0 %v863_v58, %s1290_s29 }
0x131c   :  { %v878_v35 = vpop.permute.xlu0 %877 }
0x131d   :  { %1155 = vmatprep.mubr.msk.bf16.mxu1 %vm897_vm2, %v878_v35 }
0x131e   :  { %1156 = vmatmul.mubr.msk.bf16.vlgmr.msra.gmra.mrb[16].mxu1 %vm897_vm2, %v880_v37 }
0x131f   :  { %1164 = vmatpush3.bf16.msra.mxu1 %v1222_v52 }
0x1320   :  { %v882_v43 = vpop.permute.xlu0 %881  ;;  %1165 = vmatprep.subr.bf16.mxu1 %v1223_v60 }
0x1321   :  { %1159 = vmatprep.mubr.msk.bf16.mxu1 %vm897_vm2, %v882_v43 }
0x1323   :  { %1166 = vmatpush3.bf16.msra.mxu1 %v1223_v60 }
0x1326   :  { %1160 = vmatmul.mubr.msk.bf16.gmra.mrb[20].mxu1 %vm897_vm2, %v884_v45 }
0x1327   :  { %1167 = vmatprep.mubr.msk.bf16.mxu1 %vm897_vm2, %v857_v62 }
0x132e   :  { %1168 = vmatmul.mubr.msk.bf16.vlgmr.msra.gmra.mrb[16].mxu1 %vm897_vm2, %v858_v63 }
0x132f   :  { %1171 = vmatprep.mubr.msk.bf16.mxu1 %vm897_vm2, %v859_v0 }
0x1336   :  { %1172 = vmatmul.mubr.msk.bf16.gmra.mrb[20].mxu1 %vm897_vm2, %v860_v2 }
0x1401   :  { %v1169_v4 = vpop.f32.mrb[16].mxu1 }
0x1402   :  { %v1073_v3 = vadd.f32 %v1169_v4, %v1138_v31  ;;  %v1033_v5 = vpop.f32.mrb[17].mxu1 }
0x1403   :  { %v1071_v7 = vadd.f32 %v1138_v31, %v1033_v5  ;;  %v1170_v36 = vpop.f32.mrb[18].mxu1 }
0x1404   :  { %1081 = vst [vmem:[%s1672_s7 + $0x10] sm:$0xff] %v1073_v3  ;;  %v1074_v6 = vadd.f32 %v1170_v36, %v1138_v31  ;;  %v1036_v38 = vpop.f32.mrb[19].mxu1 }
0x1405   :  { %1079 = vst [vmem:[%s1672_s7] sm:$0xff] %v1071_v7  ;;  %v1072_v8 = vadd.f32 %v1138_v31, %v1036_v38 }
0x1406   :  { %1082 = vst [vmem:[%s1672_s7 + $0x18] sm:$0xff] %v1074_v6 }
0x1407   :  { %1080 = vst [vmem:[%s1672_s7 + $0x8] sm:$0xff] %v1072_v8 }
0x1409   :  { %v1173_v10 = vpop.f32.mrb[20].mxu1 }
0x140a   :  { %v1077_v11 = vadd.f32 %v1173_v10, %v1138_v31  ;;  %v1049_v13 = vpop.f32.mrb[21].mxu1 }
0x140b   :  { %v1075_v16 = vadd.f32 %v1138_v31, %v1049_v13  ;;  %v1174_v18 = vpop.f32.mrb[22].mxu1 }
0x140c   :  { %1085 = vst [vmem:[%s1672_s7 + $0x30] sm:$0xff] %v1077_v11  ;;  %v1078_v20 = vadd.f32 %v1174_v18, %v1138_v31  ;;  %v1052_v55 = vpop.f32.mrb[23].mxu1 }
0x140d   :  { %1083 = vst [vmem:[%s1672_s7 + $0x20] sm:$0xff] %v1075_v16  ;;  %v1076_v22 = vadd.f32 %v1138_v31, %v1052_v55 }
0x140e   :  { %1086 = vst [vmem:[%s1672_s7 + $0x38] sm:$0xff] %v1078_v20 }
0x140f   :  { %1084 = vst [vmem:[%s1672_s7 + $0x28] sm:$0xff] %v1076_v22 }

</bundles_post_ra>
